<compile_context>
chip_gen: v6e
topology: v6e:2x2x1
jax: 0.10.0
libtpu: 0.0.40
codegen_flags: <defaults>
</compile_context>

<pallas_src>
import numpy as np
import jax
import jax.numpy as jnp
from jax.experimental import pallas as pl
from jax.experimental.pallas import tpu as pltpu


def _fusion_kernel(skip_ref,                       # scalar prefetch: (1,) int32
                   rgb_ref, depth_ref,
                   w1r_ref, b1r_ref, w2r_ref, b2r_ref,
                   w1d_ref, b1d_ref, w2d_ref, b2d_ref,
                   out_ref):
    rgb = rgb_ref[...].astype(jnp.float32)          # (C, T)
    dep = depth_ref[...].astype(jnp.float32)        # (C, T)

    def gate(x, w1, b1, w2, b2):
        # Per-pixel 1x1 convs == matmuls with the spatial tile on the lane axis.
        h = jnp.dot(w1, x, preferred_element_type=jnp.float32) + b1   # (C_red, T)
        h = jnp.maximum(h, 0.0)
        g = jnp.dot(w2, h, preferred_element_type=jnp.float32) + b2   # (C, T)
        return jax.nn.sigmoid(g)

    g_rgb = gate(rgb, w1r_ref[...], b1r_ref[...], w2r_ref[...], b2r_ref[...])
    g_dep = gate(dep, w1d_ref[...], b1d_ref[...], w2d_ref[...], b2d_ref[...])

    # Depth branch of the original forward: when depth.sum() < 1e-6 the depth
    # excitation is skipped (equivalent to a gate of exactly 1.0).
    skip = skip_ref[0].astype(jnp.float32)          # scalar 0.0 / 1.0
    g_dep = g_dep * (1.0 - skip) + skip

    out = rgb * (1.0 + g_rgb) + dep * g_dep         # rgb + rgb*g_rgb + depth_term
    out_ref[...] = out.astype(out_ref.dtype)


def _pick_spatial_tile(hw, c, itemsize, vmem_budget_bytes=24 << 20):
    """Largest lane tile that is a multiple of 128, divides HW, fits the budget."""
    if hw % 128 != 0:
        # TODO(synk): for HW not divisible by 128 the whole spatial extent is a
        # single (possibly masked-store) block; a very large, non-128-divisible
        # HW would need a padded copy or a split-HW two-pass variant to stay
        # inside the v7x 64 MiB VMEM.
        return hw
    # rgb + depth + out blocks, each double-buffered by the auto pipeline.
    max_lanes = max(128, vmem_budget_bytes // (6 * c * itemsize))
    cap = min(hw, (max_lanes // 128) * 128)
    t = cap
    while t >= 128:
        if hw % t == 0:
            return t
        t -= 128
    return 128


def residual_excite_fusion(rgb, depth, params_rgb, params_depth):
    """rgb, depth: (N, C, H, W); params_*: (w1(C_red,C), b1(C_red,), w2(C,C_red), b2(C,))."""
    N, C, H, W = rgb.shape
    assert depth.shape == rgb.shape
    HW = H * W
    w1_rgb, b1_rgb, w2_rgb, b2_rgb = params_rgb
    w1_dep, b1_dep, w2_dep, b2_dep = params_depth
    C_red = w1_rgb.shape[0]
    out_dtype = jnp.result_type(rgb.dtype, depth.dtype)

    # Free (metadata-only) reshapes; inputs stay in their native dtype.
    rgb_f = rgb.reshape(N, C, HW)
    dep_f = depth.reshape(N, C, HW)

    # Tiny parameters in f32; biases as column vectors -> broadcast over lanes.
    f32 = jnp.float32
    w1r = w1_rgb.astype(f32); b1r = b1_rgb.reshape(C_red, 1).astype(f32)
    w2r = w2_rgb.astype(f32); b2r = b2_rgb.reshape(C, 1).astype(f32)
    w1d = w1_dep.astype(f32); b1d = b1_dep.reshape(C_red, 1).astype(f32)
    w2d = w2_dep.astype(f32); b2d = b2_dep.reshape(C, 1).astype(f32)

    # Data-dependent branch from the PyTorch forward: depth excitation is
    # skipped when depth.sum() < 1e-6 (sum accumulated in f32). This global
    # reduction must run before the fused kernel since it gates every tile.
    skip_depth = (jnp.sum(dep_f, dtype=f32) < 1e-6).astype(jnp.int32).reshape(1)
    # TODO(synk): the rgb branch of the original forward leaves `rgb_se`
    # undefined when rgb.sum() < 1e-6 (UnboundLocalError in PyTorch); that
    # undefined path is not modeled -- rgb excitation is always applied.

    itemsize = jnp.dtype(out_dtype).itemsize
    T = _pick_spatial_tile(HW, C, itemsize)
    grid = (N, HW // T)

    # Explicit VMEM budget: 3 pipelined (double-buffered) data blocks + params.
    blk_bytes = C * T * itemsize
    vmem_needed = 6 * blk_bytes + 4 * (C * C_red + C + C_red) * 4
    vmem_limit = int(min(100 << 20, max(32 << 20, 2 * vmem_needed)))

    data_spec = pl.BlockSpec((pl.Squeezed(), C, T), lambda n, s, skip: (n, 0, s))
    const = lambda n, s, skip: (0, 0)

    out = pl.pallas_call(
        _fusion_kernel,
        out_shape=jax.ShapeDtypeStruct((N, C, HW), out_dtype),
        grid_spec=pltpu.PrefetchScalarGridSpec(
            num_scalar_prefetch=1,
            grid=grid,
            in_specs=[
                data_spec,                                   # rgb
                data_spec,                                   # depth
                pl.BlockSpec((C_red, C), const),             # w1 rgb
                pl.BlockSpec((C_red, 1), const),             # b1 rgb
                pl.BlockSpec((C, C_red), const),             # w2 rgb
                pl.BlockSpec((C, 1), const),                 # b2 rgb
                pl.BlockSpec((C_red, C), const),             # w1 depth
                pl.BlockSpec((C_red, 1), const),             # b1 depth
                pl.BlockSpec((C, C_red), const),             # w2 depth
                pl.BlockSpec((C, 1), const),                 # b2 depth
            ],
            out_specs=pl.BlockSpec((pl.Squeezed(), C, T),
                                   lambda n, s, skip: (n, 0, s)),
        ),
        compiler_params=pltpu.CompilerParams(
            dimension_semantics=("parallel", "parallel"),
            vmem_limit_bytes=vmem_limit),
    )(skip_depth, rgb_f, dep_f,
      w1r, b1r, w2r, b2r, w1d, b1d, w2d, b2d)

    return out.reshape(N, C, H, W)


def _reference_np(rgb, depth, params_rgb, params_depth):
    """Exact float64 NumPy reference of the PyTorch forward."""
    f64 = lambda a: np.asarray(a, dtype=np.float64)
    rgb = f64(rgb)
    depth = f64(depth)

    def excite(x, w1, b1, w2, b2):
        w1, b1, w2, b2 = f64(w1), f64(b1), f64(w2), f64(b2)
        h = np.einsum("rc,nchw->nrhw", w1, x) + b1[None, :, None, None]
        h = np.maximum(h, 0.0)
        g = np.einsum("cr,nrhw->nchw", w2, h) + b2[None, :, None, None]
        return x * (1.0 / (1.0 + np.exp(-g)))

    rgb_se = excite(rgb, *params_rgb)
    depth_term = depth if depth.sum() < 1e-6 else excite(depth, *params_depth)
    return rgb + rgb_se + depth_term


if __name__ == "__main__":
    # channels=32, reduction=16 -> hidden channels C_red = 2 (matches nn.Conv2d 1x1 shapes)
    N, C, H, W = 2, 32, 16, 16
    reduction = 16
    C_red = C // reduction

    key = jax.random.PRNGKey(0)
    keys = jax.random.split(key, 10)
    rgb = jax.random.normal(keys[0], (N, C, H, W), dtype=jnp.float32)
    depth = jax.random.normal(keys[1], (N, C, H, W), dtype=jnp.float32)

    params_rgb = (
        jax.random.normal(keys[2], (C_red, C), jnp.float32) * 0.1,
        jax.random.normal(keys[3], (C_red,), jnp.float32) * 0.1,
        jax.random.normal(keys[4], (C, C_red), jnp.float32) * 0.1,
        jax.random.normal(keys[5], (C,), jnp.float32) * 0.1,
    )
    params_dep = (
        jax.random.normal(keys[6], (C_red, C), jnp.float32) * 0.1,
        jax.random.normal(keys[7], (C_red,), jnp.float32) * 0.1,
        jax.random.normal(keys[8], (C, C_red), jnp.float32) * 0.1,
        jax.random.normal(keys[9], (C,), jnp.float32) * 0.1,
    )

    # Tolerance accounts for MXU reduced-precision (bf16-pass) f32 matmuls
    # inside the kernel vs. the exact float64 reference.
    ATOL = RTOL = 3e-3

    # Case 1: random depth (the branch is decided by the sign of its sum).
    out1 = residual_excite_fusion(rgb, depth, params_rgb, params_dep)
    jax.block_until_ready(out1)
    ref1 = _reference_np(rgb, depth, params_rgb, params_dep)
    assert np.allclose(np.asarray(out1), ref1, atol=ATOL, rtol=RTOL), "mismatch (case 1)"

    # Case 2: depth.sum() < 1e-6 -> depth excitation must be skipped.
    depth0 = jnp.zeros_like(depth)
    out2 = residual_excite_fusion(rgb, depth0, params_rgb, params_dep)
    jax.block_until_ready(out2)
    ref2 = _reference_np(rgb, depth0, params_rgb, params_dep)
    assert np.allclose(np.asarray(out2), ref2, atol=ATOL, rtol=RTOL), "mismatch (case 2)"

    print("KERNEL_OK")
</pallas_src>

<mosaic_0001>
module attributes {stable_mosaic.version = 11 : i64} {
  func.func @_fusion_kernel(%arg0: i32, %arg1: i32, %arg2: memref<1xi32, #tpu.memory_space<smem>>, %arg3: memref<1x32x256xf32, #tpu.memory_space<vmem>>, %arg4: memref<1x32x256xf32, #tpu.memory_space<vmem>>, %arg5: memref<2x32xf32, #tpu.memory_space<vmem>>, %arg6: memref<2x1xf32, #tpu.memory_space<vmem>>, %arg7: memref<32x2xf32, #tpu.memory_space<vmem>>, %arg8: memref<32x1xf32, #tpu.memory_space<vmem>>, %arg9: memref<2x32xf32, #tpu.memory_space<vmem>>, %arg10: memref<2x1xf32, #tpu.memory_space<vmem>>, %arg11: memref<32x2xf32, #tpu.memory_space<vmem>>, %arg12: memref<32x1xf32, #tpu.memory_space<vmem>>, %arg13: memref<1x32x256xf32, #tpu.memory_space<vmem>>) attributes {dimension_semantics = [#tpu.dimension_semantics<parallel>, #tpu.dimension_semantics<parallel>], iteration_bounds = array<i64: 2, 1>, scalar_prefetch = 1 : i64, scratch_operands = 0 : i64, tpu.core_type = #tpu.core_type<tc>, window_params = [{transform_indices = @transform_0, window_bounds = array<i64: 1, 32, 256>}, {transform_indices = @transform_1, window_bounds = array<i64: 1, 32, 256>}, {pipeline_mode = #tpu.pipeline_mode<synchronous>, transform_indices = @transform_2, window_bounds = array<i64: 2, 32>}, {pipeline_mode = #tpu.pipeline_mode<synchronous>, transform_indices = @transform_3, window_bounds = array<i64: 2, 1>}, {pipeline_mode = #tpu.pipeline_mode<synchronous>, transform_indices = @transform_4, window_bounds = array<i64: 32, 2>}, {pipeline_mode = #tpu.pipeline_mode<synchronous>, transform_indices = @transform_5, window_bounds = array<i64: 32, 1>}, {pipeline_mode = #tpu.pipeline_mode<synchronous>, transform_indices = @transform_6, window_bounds = array<i64: 2, 32>}, {pipeline_mode = #tpu.pipeline_mode<synchronous>, transform_indices = @transform_7, window_bounds = array<i64: 2, 1>}, {pipeline_mode = #tpu.pipeline_mode<synchronous>, transform_indices = @transform_8, window_bounds = array<i64: 32, 2>}, {pipeline_mode = #tpu.pipeline_mode<synchronous>, transform_indices = @transform_9, window_bounds = array<i64: 32, 1>}, {transform_indices = @transform_10, window_bounds = array<i64: 1, 32, 256>}]} {
    %c0 = arith.constant 0 : index
    %c0_0 = arith.constant 0 : index
    %c0_1 = arith.constant 0 : index
    %0 = vector.load %arg3[%c0, %c0_0, %c0_1] : memref<1x32x256xf32, #tpu.memory_space<vmem>>, vector<1x32x256xf32>
    %1 = vector.shape_cast %0 : vector<1x32x256xf32> to vector<32x256xf32>
    %c0_2 = arith.constant 0 : index
    %c0_3 = arith.constant 0 : index
    %c0_4 = arith.constant 0 : index
    %2 = vector.load %arg4[%c0_2, %c0_3, %c0_4] : memref<1x32x256xf32, #tpu.memory_space<vmem>>, vector<1x32x256xf32>
    %3 = vector.shape_cast %2 : vector<1x32x256xf32> to vector<32x256xf32>
    %c0_5 = arith.constant 0 : index
    %c0_6 = arith.constant 0 : index
    %4 = vector.load %arg5[%c0_5, %c0_6] : memref<2x32xf32, #tpu.memory_space<vmem>>, vector<2x32xf32>
    %c0_7 = arith.constant 0 : index
    %c0_8 = arith.constant 0 : index
    %5 = vector.load %arg6[%c0_7, %c0_8] : memref<2x1xf32, #tpu.memory_space<vmem>>, vector<2x1xf32>
    %c0_9 = arith.constant 0 : index
    %c0_10 = arith.constant 0 : index
    %6 = vector.load %arg7[%c0_9, %c0_10] : memref<32x2xf32, #tpu.memory_space<vmem>>, vector<32x2xf32>
    %c0_11 = arith.constant 0 : index
    %c0_12 = arith.constant 0 : index
    %7 = vector.load %arg8[%c0_11, %c0_12] : memref<32x1xf32, #tpu.memory_space<vmem>>, vector<32x1xf32>
    %cst = arith.constant dense<0.000000e+00> : vector<2x256xf32>
    %8 = tpu.matmul %4, %1, %cst {dimension_numbers = #tpu.dot_dimension_numbers<[1], [0], [0], [1], [0, 0, 1, 1], [], []>} : vector<2x32xf32>, vector<32x256xf32>, vector<2x256xf32> -> vector<2x256xf32>
    %9 = vector.broadcast %5 : vector<2x1xf32> to vector<2x256xf32>
    %10 = arith.addf %8, %9 : vector<2x256xf32>
    %cst_13 = arith.constant 0.000000e+00 : f32
    %11 = vector.broadcast %cst_13 : f32 to vector<2x256xf32>
    %12 = arith.maximumf %10, %11 : vector<2x256xf32>
    %cst_14 = arith.constant dense<0.000000e+00> : vector<32x256xf32>
    %13 = tpu.matmul %6, %12, %cst_14 {dimension_numbers = #tpu.dot_dimension_numbers<[1], [0], [0], [1], [0, 0, 1, 1], [], []>} : vector<32x2xf32>, vector<2x256xf32>, vector<32x256xf32> -> vector<32x256xf32>
    %14 = vector.broadcast %7 : vector<32x1xf32> to vector<32x256xf32>
    %15 = arith.addf %13, %14 : vector<32x256xf32>
    %16 = arith.negf %15 : vector<32x256xf32>
    %17 = math.exp %16 : vector<32x256xf32>
    %cst_15 = arith.constant 1.000000e+00 : f32
    %18 = vector.broadcast %cst_15 : f32 to vector<32x256xf32>
    %19 = arith.addf %18, %17 : vector<32x256xf32>
    %20 = arith.divf %18, %19 : vector<32x256xf32>
    %c0_16 = arith.constant 0 : index
    %c0_17 = arith.constant 0 : index
    %21 = vector.load %arg9[%c0_16, %c0_17] : memref<2x32xf32, #tpu.memory_space<vmem>>, vector<2x32xf32>
    %c0_18 = arith.constant 0 : index
    %c0_19 = arith.constant 0 : index
    %22 = vector.load %arg10[%c0_18, %c0_19] : memref<2x1xf32, #tpu.memory_space<vmem>>, vector<2x1xf32>
    %c0_20 = arith.constant 0 : index
    %c0_21 = arith.constant 0 : index
    %23 = vector.load %arg11[%c0_20, %c0_21] : memref<32x2xf32, #tpu.memory_space<vmem>>, vector<32x2xf32>
    %c0_22 = arith.constant 0 : index
    %c0_23 = arith.constant 0 : index
    %24 = vector.load %arg12[%c0_22, %c0_23] : memref<32x1xf32, #tpu.memory_space<vmem>>, vector<32x1xf32>
    %cst_24 = arith.constant dense<0.000000e+00> : vector<2x256xf32>
    %25 = tpu.matmul %21, %3, %cst_24 {dimension_numbers = #tpu.dot_dimension_numbers<[1], [0], [0], [1], [0, 0, 1, 1], [], []>} : vector<2x32xf32>, vector<32x256xf32>, vector<2x256xf32> -> vector<2x256xf32>
    %26 = vector.broadcast %22 : vector<2x1xf32> to vector<2x256xf32>
    %27 = arith.addf %25, %26 : vector<2x256xf32>
    %cst_25 = arith.constant 0.000000e+00 : f32
    %28 = vector.broadcast %cst_25 : f32 to vector<2x256xf32>
    %29 = arith.maximumf %27, %28 : vector<2x256xf32>
    %cst_26 = arith.constant dense<0.000000e+00> : vector<32x256xf32>
    %30 = tpu.matmul %23, %29, %cst_26 {dimension_numbers = #tpu.dot_dimension_numbers<[1], [0], [0], [1], [0, 0, 1, 1], [], []>} : vector<32x2xf32>, vector<2x256xf32>, vector<32x256xf32> -> vector<32x256xf32>
    %31 = vector.broadcast %24 : vector<32x1xf32> to vector<32x256xf32>
    %32 = arith.addf %30, %31 : vector<32x256xf32>
    %33 = arith.negf %32 : vector<32x256xf32>
    %34 = math.exp %33 : vector<32x256xf32>
    %cst_27 = arith.constant 1.000000e+00 : f32
    %35 = vector.broadcast %cst_27 : f32 to vector<32x256xf32>
    %36 = arith.addf %35, %34 : vector<32x256xf32>
    %37 = arith.divf %35, %36 : vector<32x256xf32>
    %c0_28 = arith.constant 0 : index
    %38 = memref.load %arg2[%c0_28] : memref<1xi32, #tpu.memory_space<smem>>
    %39 = arith.sitofp %38 : i32 to f32
    %cst_29 = arith.constant 1.000000e+00 : f32
    %40 = arith.subf %cst_29, %39 : f32
    %41 = vector.broadcast %40 : f32 to vector<32x256xf32>
    %42 = arith.mulf %37, %41 : vector<32x256xf32>
    %43 = vector.broadcast %39 : f32 to vector<32x256xf32>
    %44 = arith.addf %42, %43 : vector<32x256xf32>
    %cst_30 = arith.constant 1.000000e+00 : f32
    %45 = vector.broadcast %cst_30 : f32 to vector<32x256xf32>
    %46 = arith.addf %45, %20 : vector<32x256xf32>
    %47 = arith.mulf %1, %46 : vector<32x256xf32>
    %48 = arith.mulf %3, %44 : vector<32x256xf32>
    %49 = arith.addf %47, %48 : vector<32x256xf32>
    %c0_31 = arith.constant 0 : index
    %c0_32 = arith.constant 0 : index
    %c0_33 = arith.constant 0 : index
    %50 = vector.load %arg13[%c0_31, %c0_32, %c0_33] : memref<1x32x256xf32, #tpu.memory_space<vmem>>, vector<1x32x256xf32>
    %51 = vector.shape_cast %50 : vector<1x32x256xf32> to vector<32x256xf32>
    %52 = vector.shape_cast %49 : vector<32x256xf32> to vector<1x32x256xf32>
    tpu.vector_store %arg13[%c0_31, %c0_32, %c0_33], %52 {strides = array<i32>} : memref<1x32x256xf32, #tpu.memory_space<vmem>>, vector<1x32x256xf32>,
    return
  }
  func.func @transform_0(%arg0: i32, %arg1: i32, %arg2: memref<1xi32, #tpu.memory_space<smem>>) -> (i32, i32, i32) {
    %c0_i32 = arith.constant 0 : i32
    %c0_i32_0 = arith.constant 0 : i32
    return %arg0, %c0_i32, %arg1 : i32, i32, i32
  }
  func.func @transform_1(%arg0: i32, %arg1: i32, %arg2: memref<1xi32, #tpu.memory_space<smem>>) -> (i32, i32, i32) {
    %c0_i32 = arith.constant 0 : i32
    %c0_i32_0 = arith.constant 0 : i32
    return %arg0, %c0_i32, %arg1 : i32, i32, i32
  }
  func.func @transform_2(%arg0: i32, %arg1: i32, %arg2: memref<1xi32, #tpu.memory_space<smem>>) -> (i32, i32) {
    %c0_i32 = arith.constant 0 : i32
    %c0_i32_0 = arith.constant 0 : i32
    %c0_i32_1 = arith.constant 0 : i32
    return %c0_i32, %c0_i32_0 : i32, i32
  }
  func.func @transform_3(%arg0: i32, %arg1: i32, %arg2: memref<1xi32, #tpu.memory_space<smem>>) -> (i32, i32) {
    %c0_i32 = arith.constant 0 : i32
    %c0_i32_0 = arith.constant 0 : i32
    %c0_i32_1 = arith.constant 0 : i32
    return %c0_i32, %c0_i32_0 : i32, i32
  }
  func.func @transform_4(%arg0: i32, %arg1: i32, %arg2: memref<1xi32, #tpu.memory_space<smem>>) -> (i32, i32) {
    %c0_i32 = arith.constant 0 : i32
    %c0_i32_0 = arith.constant 0 : i32
    %c0_i32_1 = arith.constant 0 : i32
    return %c0_i32, %c0_i32_0 : i32, i32
  }
  func.func @transform_5(%arg0: i32, %arg1: i32, %arg2: memref<1xi32, #tpu.memory_space<smem>>) -> (i32, i32) {
    %c0_i32 = arith.constant 0 : i32
    %c0_i32_0 = arith.constant 0 : i32
    %c0_i32_1 = arith.constant 0 : i32
    return %c0_i32, %c0_i32_0 : i32, i32
  }
  func.func @transform_6(%arg0: i32, %arg1: i32, %arg2: memref<1xi32, #tpu.memory_space<smem>>) -> (i32, i32) {
    %c0_i32 = arith.constant 0 : i32
    %c0_i32_0 = arith.constant 0 : i32
    %c0_i32_1 = arith.constant 0 : i32
    return %c0_i32, %c0_i32_0 : i32, i32
  }
  func.func @transform_7(%arg0: i32, %arg1: i32, %arg2: memref<1xi32, #tpu.memory_space<smem>>) -> (i32, i32) {
    %c0_i32 = arith.constant 0 : i32
    %c0_i32_0 = arith.constant 0 : i32
    %c0_i32_1 = arith.constant 0 : i32
    return %c0_i32, %c0_i32_0 : i32, i32
  }
  func.func @transform_8(%arg0: i32, %arg1: i32, %arg2: memref<1xi32, #tpu.memory_space<smem>>) -> (i32, i32) {
    %c0_i32 = arith.constant 0 : i32
    %c0_i32_0 = arith.constant 0 : i32
    %c0_i32_1 = arith.constant 0 : i32
    return %c0_i32, %c0_i32_0 : i32, i32
  }
  func.func @transform_9(%arg0: i32, %arg1: i32, %arg2: memref<1xi32, #tpu.memory_space<smem>>) -> (i32, i32) {
    %c0_i32 = arith.constant 0 : i32
    %c0_i32_0 = arith.constant 0 : i32
    %c0_i32_1 = arith.constant 0 : i32
    return %c0_i32, %c0_i32_0 : i32, i32
  }
  func.func @transform_10(%arg0: i32, %arg1: i32, %arg2: memref<1xi32, #tpu.memory_space<smem>>) -> (i32, i32, i32) {
    %c0_i32 = arith.constant 0 : i32
    %c0_i32_0 = arith.constant 0 : i32
    return %arg0, %c0_i32, %arg1 : i32, i32, i32
  }
}

</mosaic_0001>

<bundles_post_ra>
// kernel: tpu_custom_call.1
= control target key start
LH: loop header
LB: loop body
LE: loop exit
PB: predicated region body
PF: predicated region fallthrough
CT: control target
= control target key end

     0   :  { %s1889_s0 = inlined_call_operand.<no memory space> [shape: s32[1], index: 0, kind: input, shape index: {}]   ;;  %s1890_s1 = inlined_call_operand.vmem [shape: f32[2,32,256], index: 1, kind: input, shape index: {}]   ;;  %s1891_s2 = inlined_call_operand.hbm [shape: f32[2,32,256], index: 2, kind: input, shape index: {}]   ;;  %s1892_s3 = inlined_call_operand.vmem [shape: f32[2,32], index: 3, kind: input, shape index: {}]   ;;  %s1893_s4 = inlined_call_operand.vmem [shape: f32[2,1], index: 4, kind: input, shape index: {}]   ;;  %s1894_s5 = inlined_call_operand.vmem [shape: f32[32,2], index: 5, kind: input, shape index: {}]   ;;  %s1895_s6 = inlined_call_operand.vmem [shape: f32[32,1], index: 6, kind: input, shape index: {}]   ;;  %s1896_s7 = inlined_call_operand.vmem [shape: f32[2,32], index: 7, kind: input, shape index: {}]   ;;  %s1897_s8 = inlined_call_operand.vmem [shape: f32[2,1], index: 8, kind: input, shape index: {}]   ;;  %s1898_s9 = inlined_call_operand.vmem [shape: f32[32,2], index: 9, kind: input, shape index: {}]   ;;  %s1899_s10 = inlined_call_operand.vmem [shape: f32[32,1], index: 10, kind: input, shape index: {}]   ;;  %s1900_s11 = inlined_call_operand.hbm [shape: f32[2,32,256], index: 11, kind: output, shape index: {}]  }
   0x1   :  { %16 = sst [smem:[#allocation3]] %s1889_s0 }
   0x2   :  { %17 = vsyncpa [#allocation5], 0 }
   0x3   :  { %19 = vsyncpa [#allocation5 + $0x1], 0 }
   0x4   :  { %20 = vsyncpa [#allocation6], 0 }
   0x5   :  { %22 = vsyncpa [#allocation6 + $0x1], 0  ;;  %s1536_s19 = smov 0   ;;  %s1538_s20 = smov 0  }
   0x6   :  { %s1540_s21 = smov 0   ;;  %s1542_s22 = smov 0  }
   0x7   :  { %s1544_s23 = smov 0   ;;  %s1546_s24 = smov 0  }
   0x8 LB: > { %1904 = sst [smem:[#allocation10_spill]] %s1443_s19  ;;  %s1169_s0 = sadd.s32 4294967295, %s1463_s24   ;;  %s1463_s24 = sphi %s1546_s24, %s28_s24   ;;  %s1459_s23 = sphi %s1544_s23, %s1917_s23   ;;  %s1455_s22 = sphi %s1542_s22, %s1916_s22   ;;  %s1451_s21 = sphi %s1540_s21, %s1920_s21   ;;  %s1447_s20 = sphi %s1538_s20, %s1919_s20   ;;  %s1443_s19 = sphi %s1536_s19, %s1918_s19  }
   0x9   : > { %1905 = sst [smem:[#allocation11_spill]] %s1459_s23  ;;  %s1170_s25 = sadd.s32 4294967294, %s1463_s24  }
   0xa   : > { %s40_s26 = sadd.s32 1, %s1459_s23  ;;  %s77_s27 = sadd.s32 1, %s1451_s21 }
   0xb   : > { %p42_p0 = scmp.ge.s32.totalorder %s40_s26, 2  ;;  %p84_p1 = scmp.ne.s32.totalorder %s1451_s21, %s1447_s20 }
   0xc   : > { %p85_p2 = scmp.eq.s32.totalorder %s1463_s24, 0  ;;  %p90_p3 = scmp.ne.s32.totalorder %s1447_s20, %s1443_s19 }
   0xd   : > { %s1922_s26 = smov (%p42_p0, %s40_s26), 0  ;;  %p91_p5 = scmp.eq.s32.totalorder %s1169_s0, 0 }
   0xe   : > { %1906 = sst [smem:[#allocation12_spill]] %s1922_s26  ;;  %p1577_p4 = por %p85_p2, %p84_p1 }
   0xf   : > { %s72_s29 = ssub.s32 %s1459_s23, %s1922_s26  ;;  %p284_p6 = scmp.eq.s32.totalorder %s1169_s0, 1 }
  0x10   : > { %p75_p7 = scmp.eq.s32.totalorder %s72_s29, 0  ;;  %p1583_p8 = por %p91_p5, %p90_p3 }
  0x11   : > { %p1587_p9 = por %p284_p6, %p84_p1  ;;  %p290_p10 = scmp.eq.s32.totalorder %s1170_s25, 1 }
  0x12   : > { %s1592_s13 = scalar_select %p75_p7, %s1451_s21, %s77_s27  }
  0x13   : > { %p1594_p11 = por %p290_p10, %p90_p3  ;;  %p1233_p13 = scmp.lt.s32.totalorder %s1463_s24, 2 }
  0x14   : > { %1910 = sst [smem:[#allocation13_spill]] %s1592_s13  ;;  %s347_s15 = sand.u32 1, %s1451_s21  }
  0x15   : > { %s1173_s16 = sshll.u32 %s347_s15, 6  ;;  %s1216_s17 = sshll.u32 %s1459_s23, 10 }
  0x16   : > { %s359_s29 = scalar_lea.hbm %s1891_s2, %s1216_s17  ;;  %s351_s26 = scalar_lea.vmem [#allocation4], %s1173_s16 }
  0x17   : > { %s360_s19 = sshll.u32 %s351_s26, 4  ;;  %p1607_p0 = pnand %p1233_p13, %p1577_p4  ;;  %s361_s19 = int_to_ptr.vmem [resolvable:$true] %s360_s19 }
  0x18   : > { %p1176_p1 = scmp.ge.s32.totalorder %s1463_s24, 1  ;;  %s348_s27 = scalar_lea.sflag [#allocation5], %s347_s15 }
  0x19   : > { %p1357_p2 = pneg %p1607_p0  ;;  %s1368_s13 = scalar_lea.vmem %s361_s19, 1024 }
  0x1a   : > { %p1369_p3 = scmp.ne.s32.totalorder %s361_s19, %s1368_s13  ;;  %s1465_s23 = smov [#allocation4]  }
  0x1b   : > { %s1373_s18 = sshll.u32 %s1465_s23, 4  ;;  %s1374_s18 = int_to_ptr.vmem [resolvable:$false] %s1373_s18 }
  0x1c   : > { %p1371_p5 = pnand %p1369_p3, %p1357_p2  ;;  %s1375_s16 = scalar_lea.vmem %s1374_s18, 2048 }
  0x1d   : > { %p1376_p7 = scmp.lt.s32.totalorder %s361_s19, %s1374_s18  ;;  %p1377_p10 = scmp.lt.s32.totalorder %s1375_s16, %s1368_s13 }
  0x1e   : > { %p1372_p6 = pneg %p1371_p5 }
  0x1f   : > { %p1378_p12 = por %p1377_p10, %p1376_p7 }
  0x21   : > { %p1379_p4 = pnand %p1378_p12, %p1372_p6 }
  0x23   : > { %1382 = shalt.err (!%p1379_p4)
}
  0x24   : > { %s1466_s26 = smov 256   ;;  %s1467_s28 = smov 16  }
  0x25   : > { %1228 = dma.hbm_to_vmem [thread:$0]  (!%p1607_p0), %s359_s29, 1024, %s361_s19, %s348_s27, %s1466_s26, %s1466_s26, %s1467_s28  }
  0x26   : > { %p368_p13 = scmp.lt.s32.totalorder %s1463_s24, 3 }
  0x28   : > { %p369_p2 = pnand %p1176_p1, %p368_p13 }
  0x29   : > { %s1620_s23 = sand.u32 (!%p369_p2), 1, %s1447_s20  }
  0x2a   : > { %372 = sbr.rel (%p369_p2) target bundleno = 737 (0x2e1), region = 60  ;;  %s1177_s13 = sshll.u32 (!%p369_p2), %s1620_s23, 6 }
  0x2b   : > { %s375_s15 = scalar_lea.sflag (!%p369_p2), [#allocation5], %s1620_s23  ;;  %s1626_s17 = scalar_lea.vmem (!%p369_p2), [#allocation4], %s1177_s13 }
  0x2f   : > { %1434 = dma.done.wait (%p1583_p8), %s375_s15, 1024  }
  0x30   : > { %1436 = vsyncadd (%p1583_p8), %s375_s15, 4294966272  ;;  %p425_p12 = scmp.lt.s32.totalorder %s1455_s22, 1  ;;  %v1468_v0 = vmov 0.0   ;;  %v1469_v1 = vmov 0   ;;  %v453_v8 = vld [vmem:[%s1893_s4] sm:$0x3] }
  0x31   : > { %535 = vmatprep.mubr.f32.mxu0 %v1468_v0  ;;  %1289 = vset.pattern.permute.xlu0 %v1469_v1  ;;  %v722_v11 = vld [vmem:[%s1897_s8] sm:$0x3]  ;;  %vm467_vm0 = vcmask 261120   ;;  %v729_v13 = vld [vmem:[%s1899_s10 + $0x10] sm:$0xff]  ;;  %v728_v17 = vld [vmem:[%s1899_s10 + $0x8] sm:$0xff]  ;;  %vm577_vm1 = vcmask 1041408  }
  0x32   : > { %s426_s19 = scalar_select %p425_p12, %s1455_s22, 1  ;;  %660 = vmatprep.mubr.f32.mxu1 %v1468_v0  ;;  %1290 = vset.pattern.permute.xlu1 %v1469_v1  ;;  %v452_v12 = vld [vmem:[%s1892_s3] sm:$0x3]  ;;  %v460_v15 = vld [vmem:[%s1895_s6 + $0x10] sm:$0xff]  ;;  %v730_v18 = vld [vmem:[%s1899_s10 + $0x18] sm:$0xff]  ;;  %vm564_vm2 = vcmask 15360  }
  0x33   : > { %464 = vperm.xlu0 %1289, %v453_v8   ;;  %v458_v14 = vld [vmem:[%s1895_s6] sm:$0xff]  ;;  %v459_v19 = vld [vmem:[%s1895_s6 + $0x8] sm:$0xff]  ;;  %v456_v28 = vld [vmem:[%s1894_s5 + $0x10] sm:$0xff]  ;;  %s1804_s29 = scalar_lea.vmem [#allocation7], %s1177_s13  ;;  %s1218_s13 = sshll.u32 %s1455_s22, 10 }
  0x34   : > { %s1217_s0 = sshll.u32 %s426_s19, 6  ;;  %v727_v16 = vld [vmem:[%s1899_s10] sm:$0xff]  ;;  %v1704_v29 = vld [vmem:[%s1626_s17 + $0x38] sm:$0xff]  ;;  %v1709_v30 = vld [vmem:[%s1626_s17 + $0x30] sm:$0xff]  ;;  %s1783_s19 = sld [smem:[#allocation3]] }
  0x35   : > { %s432_s27 = scalar_lea.vmem %s1890_s1, %s1217_s0  ;;  %814 = vperm.xlu1 %1290, %v727_v16   ;;  %v454_v27 = vld [vmem:[%s1894_s5] sm:$0xff]  ;;  %v1714_v31 = vld [vmem:[%s1626_s17 + $0x28] sm:$0xff]  ;;  %v1726_v34 = vld [vmem:[%s1626_s17 + $0x18] sm:$0xff]  ;;  %s1064_s25 = sshll.u32 %s1804_s29, 4  ;;  %s1839_s25 = int_to_ptr.vmem [resolvable:$true] %s1064_s25 }
  0x36   : > { %v1639_v2 = vld [vmem:[%s432_s27 + $0x38] sm:$0xff]  ;;  %v1641_v3 = vld [vmem:[%s432_s27 + $0x30] sm:$0xff]  ;;  %v1643_v4 = vld [vmem:[%s432_s27 + $0x28] sm:$0xff]  ;;  %s1837_s18 = scalar_lea.hbm %s1900_s11, %s1218_s13  ;;  %s1049_s22 = scalar_lea.sflag [#allocation6], %s1620_s23 }
  0x37   : > { %495 = vmatprep.subr.mxu0 %v1639_v2  ;;  %v1646_v5 = vld [vmem:[%s432_s27 + $0x20] sm:$0xff]  ;;  %v1649_v6 = vld [vmem:[%s432_s27 + $0x18] sm:$0xff]  ;;  %v1652_v7 = vld [vmem:[%s432_s27 + $0x10] sm:$0xff]  ;;  %733 = vperm.xlu0 %1289, %v722_v11   ;;  %s1383_s16 = scalar_lea.vmem %s1839_s25, 1024  ;;  %s1470_s26 = smov [#allocation7]  }
  0x38   : > { %496 = vmatpush1.msra.mxu0 %v1641_v3  ;;  %v1658_v9 = vld [vmem:[%s432_s27 + $0x8] sm:$0xff]  ;;  %v1661_v10 = vld [vmem:[%s432_s27] sm:$0xff]  ;;  %v1731_v35 = vld [vmem:[%s1626_s17 + $0x10] sm:$0xff]  ;;  %p1384_p8 = scmp.ne.s32.totalorder %s1839_s25, %s1383_s16  ;;  %s1387_s28 = sshll.u32 %s1470_s26, 4  ;;  %s1388_s28 = int_to_ptr.vmem [resolvable:$false] %s1387_s28 }
  0x39   : > { %497 = vmatprep.subr.mxu0 %v1643_v4  ;;  %819 = vperm.xlu1 %1290, %v728_v17   ;;  %v1719_v32 = vld [vmem:[%s1626_s17 + $0x20] sm:$0xff]  ;;  %v455_v33 = vld [vmem:[%s1894_s5 + $0x8] sm:$0xff]  ;;  %v457_v39 = vld [vmem:[%s1894_s5 + $0x18] sm:$0xff]  ;;  %s1389_s15 = scalar_lea.vmem %s1388_s28, 2048  ;;  %p1390_p3 = scmp.lt.s32.totalorder %s1839_s25, %s1388_s28 }
  0x3a   : > { %498 = vmatpush1.msra.mxu0 %v1646_v5  ;;  %v1735_v36 = vld [vmem:[%s1626_s17 + $0x8] sm:$0xff]  ;;  %v1740_v37 = vld [vmem:[%s1626_s17] sm:$0xff]  ;;  %v461_v40 = vld [vmem:[%s1895_s6 + $0x18] sm:$0xff]  ;;  %s988_s0 = scvt.s32.f32 %s1783_s19  ;;  %p1385_p0 = pnand %p1384_p8, %p1587_p9 }
  0x3b   : > { %499 = vmatprep.subr.mxu0 %v1649_v6  ;;  %824 = vperm.xlu0 %1289, %v729_v13   ;;  %v721_v38 = vld [vmem:[%s1896_s7] sm:$0x3]  ;;  %v724_v53 = vld [vmem:[%s1898_s9 + $0x8] sm:$0xff]  ;;  %v725_v54 = vld [vmem:[%s1898_s9 + $0x10] sm:$0xff]  ;;  %p1391_p5 = scmp.lt.s32.totalorder %s1389_s15, %s1383_s16 }
  0x3c   : > { %500 = vmatpush1.msra.mxu0 %v1652_v7  ;;  %v723_v52 = vld [vmem:[%s1898_s9] sm:$0xff]  ;;  %v726_v55 = vld [vmem:[%s1898_s9 + $0x18] sm:$0xff]  ;;  %s989_s17 = ssub.f32 1.0, %s988_s0  ;;  %p1386_p1 = pneg %p1385_p0 }
  0x3d   : > { %501 = vmatprep.subr.mxu0 %v1658_v9  ;;  %829 = vperm.xlu1 %1290, %v730_v18   ;;  %p1392_p6 = por %p1391_p5, %p1390_p3 }
  0x3e   : > { %502 = vmatpush1.msra.mxu0 %v1661_v10 }
  0x3f   : > { %1181 = vmatmul.mubr.msk.f32.vlgmr.msra.gmra.mxu0 %vm467_vm0, %v452_v12  ;;  %546 = vperm.xlu0 %1289, %v458_v14   ;;  %p1393_p7 = pnand %p1392_p6, %p1386_p1 }
  0x40   : > { %648 = vmatprep.mubr.f32.mxu0 %v1468_v0 }
  0x41   : > { %551 = vperm.xlu1 %1290, %v459_v19  }
  0x43   : > { %556 = vperm.xlu0 %1289, %v460_v15  }
  0x45   : > { %561 = vperm.xlu1 %1290, %v461_v40  }
  0xae   : > { %v465_v21 = vpop.permute.xlu0 %464 }
  0xb0   : > { %v815_v56 = vpop.permute.xlu1 %814 }
  0xb2   : > { %v734_v46 = vpop.permute.xlu0 %733 }
  0xb4   : > { %v820_v57 = vpop.permute.xlu1 %819 }
  0xb6   : > { %v825_v58 = vpop.permute.xlu0 %824 }
  0xb8   : > { %v1779_v59 = vpop.permute.xlu1 %829 }
  0xba   : > { %v547_v61 = vpop.permute.xlu0 %546 }
  0xbc   : > { %v552_v63 = vpop.permute.xlu1 %551 }
  0xbe   : > { %v557_v15 = vpop.permute.xlu0 %556 }
  0xc0   : > { %v562_v19 = vpop.permute.xlu1 %561 }
  0xff   : > { %v537_v20 = vpop.f32.mrf.mxu0 }
 0x100   : > { %v538_v22 = vadd.f32 %v537_v20, %v465_v21 }
 0x101   : > { %v539_v23 = vpop.f32.mrf.mxu0 }
 0x102   : > { %v540_v24 = vadd.f32 %v539_v23, %v465_v21  ;;  %v542_v26 = vmax.f32 %v538_v22, 0.0 }
 0x104   : > { %v543_v25 = vmax.f32 %v540_v24, 0.0 }
 0x106   : > { %1182 = vmatprep.subr.msk.mxu0 %vm577_vm1, %v543_v25  ;;  %1219 = vmatprep.subr.msk.mxu1 %vm577_vm1, %v543_v25 }
 0x107   : > { %1183 = vmatpush1.msk.msra.mxu0 %vm577_vm1, %v542_v26  ;;  %1220 = vmatpush1.msk.msra.mxu1 %vm577_vm1, %v542_v26 }
 0x108   : > { %1184 = vmatmul.mubr.msk.f32.vlgmr.msra.gmra.mxu0 %vm564_vm2, %v454_v27  ;;  %1186 = vmatmul.mubr.msk.f32.vlgmr.msra.gmra.mxu1 %vm564_vm2, %v456_v28 }
 0x109   : > { %763 = vmatprep.subr.mxu0 %v1704_v29  ;;  %654 = vmatprep.mubr.f32.mxu0 %v1468_v0 }
 0x10a   : > { %764 = vmatpush1.msra.mxu0 %v1709_v30  ;;  %666 = vmatprep.mubr.f32.mxu1 %v1468_v0 }
 0x10b   : > { %765 = vmatprep.subr.mxu0 %v1714_v31 }
 0x10c   : > { %766 = vmatpush1.msra.mxu0 %v1719_v32  ;;  %1187 = vmatmul.mubr.msk.f32.gmra.mxu1 %vm564_vm2, %v457_v39 }
 0x10d   : > { %1185 = vmatmul.mubr.msk.f32.gmra.mxu0 %vm564_vm2, %v455_v33  ;;  %767 = vmatprep.subr.mxu0 %v1726_v34 }
 0x10e   : > { %768 = vmatpush1.msra.mxu0 %v1731_v35  ;;  %803 = vmatprep.mubr.f32.mxu0 %v1468_v0 }
 0x10f   : > { %769 = vmatprep.subr.mxu0 %v1735_v36  ;;  %914 = vmatprep.mubr.f32.mxu1 %v1468_v0 }
 0x110   : > { %770 = vmatpush1.msra.mxu0 %v1740_v37 }
 0x111   : > { %1196 = vmatmul.mubr.msk.f32.vlgmr.msra.gmra.mxu0 %vm467_vm0, %v721_v38 }
 0x1c8   : > { %v650_v41 = vpop.f32.mrf.mxu0  ;;  %v662_v60 = vpop.f32.mrf.mxu1 }
 0x1c9   : > { %v651_v62 = vadd.f32 %v650_v41, %v547_v61  ;;  %v663_v16 = vadd.f32 %v662_v60, %v557_v15 }
 0x1ca   : > { %v652_v42 = vpop.f32.mrf.mxu0  ;;  %v664_v8 = vpop.f32.mrf.mxu1 }
 0x1cb   : > { %v653_v1 = vadd.f32 %v652_v42, %v547_v61  ;;  %v1188_v11 = vmul.f32 -1.442695, %v651_v62  ;;  %v665_v20 = vadd.f32 %v664_v8, %v557_v15  ;;  %v1192_v24 = vmul.f32 -1.442695, %v663_v16 }
 0x1cd   : > { %v656_v43 = vpop.f32.mrf.mxu0  ;;  %v1189_v13 = vmul.f32 -1.442695, %v653_v1  ;;  %1291 = vpow2.f32 %v1188_v11  ;;  %v1193_v33 = vmul.f32 -1.442695, %v665_v20 }
 0x1ce   : > { %v657_v12 = vadd.f32 %v656_v43, %v552_v63 }
 0x1cf   : > { %v658_v44 = vpop.f32.mrf.mxu0  ;;  %1293 = vpow2.f32 %v1189_v13 }
 0x1d0   : > { %v659_v14 = vadd.f32 %v658_v44, %v552_v63  ;;  %v1190_v17 = vmul.f32 -1.442695, %v657_v12 }
 0x1d1   : > { %v805_v45 = vpop.f32.mrf.mxu0 }
 0x1d2   : > { %v806_v47 = vadd.f32 %v805_v45, %v734_v46  ;;  %v1191_v21 = vmul.f32 -1.442695, %v659_v14  ;;  %1295 = vpow2.f32 %v1190_v17 }
 0x1d3   : > { %v807_v48 = vpop.f32.mrf.mxu0 }
 0x1d4   : > { %v808_v49 = vadd.f32 %v807_v48, %v734_v46  ;;  %v810_v51 = vmax.f32 %v806_v47, 0.0  ;;  %1297 = vpow2.f32 %v1191_v21 }
 0x1d6   : > { %v811_v50 = vmax.f32 %v808_v49, 0.0 }
 0x1d8   : > { %1197 = vmatprep.subr.msk.mxu1 %vm577_vm1, %v811_v50 }
 0x1d9   : > { %1198 = vmatpush1.msk.msra.mxu1 %vm577_vm1, %v810_v51 }
 0x1da   : > { %1199 = vmatmul.mubr.msk.f32.vlgmr.msra.gmra.mxu1 %vm564_vm2, %v723_v52  ;;  %v1292_v51 = vpop.eup %1291 }
 0x1db   : > { %920 = vmatprep.mubr.f32.mxu1 %v1468_v0 }
 0x1de   : > { %1200 = vmatmul.mubr.msk.f32.gmra.mxu1 %vm564_vm2, %v724_v53 }
 0x1df   : > { %926 = vmatprep.mubr.f32.mxu1 %v1468_v0 }
 0x1e2   : > { %1201 = vmatmul.mubr.msk.f32.gmra.mxu1 %vm564_vm2, %v725_v54 }
 0x1e3   : > { %932 = vmatprep.mubr.f32.mxu1 %v1468_v0  ;;  %v668_v0 = vpop.f32.mrf.mxu1 }
 0x1e4   : > { %v669_v26 = vadd.f32 %v668_v0, %v562_v19 }
 0x1e5   : > { %v670_v18 = vpop.f32.mrf.mxu1 }
 0x1e6   : > { %1202 = vmatmul.mubr.msk.f32.gmra.mxu1 %vm564_vm2, %v726_v55  ;;  %v671_v38 = vadd.f32 %v670_v18, %v562_v19  ;;  %v1194_v42 = vmul.f32 -1.442695, %v669_v26  ;;  %v1294_v55 = vpop.eup %1293 }
 0x1e7   : > { %v1296_v62 = vpop.eup %1295  ;;  %v698_v8 = vadd.f32 1.0, %v1294_v55 }
 0x1e8   : > { %v1195_v46 = vmul.f32 -1.442695, %v671_v38  ;;  %v1298_v11 = vpop.eup %1297  ;;  %v699_v0 = vadd.f32 1.0, %v1296_v62 }
 0x1e9   : > { %v700_v16 = vadd.f32 1.0, %v1298_v11 }
 0x29a   : > { %v916_v22 = vpop.f32.mrf.mxu1 }
 0x29b   : > { %v917_v23 = vadd.f32 %v916_v22, %v815_v56 }
 0x29c   : > { %v918_v25 = vpop.f32.mrf.mxu1 }
 0x29d   : > { %v1203_v27 = vmul.f32 -1.442695, %v917_v23  ;;  %v919_v28 = vadd.f32 %v918_v25, %v815_v56 }
 0x29e   : > { %v922_v39 = vpop.f32.mrf.mxu1 }
 0x29f   : > { %1299 = vpow2.f32 %v1203_v27  ;;  %v1204_v40 = vmul.f32 -1.442695, %v919_v28  ;;  %v923_v41 = vadd.f32 %v922_v39, %v820_v57 }
 0x2a0   : > { %1301 = vpow2.f32 %v1192_v24  ;;  %v924_v43 = vpop.f32.mrf.mxu1 }
 0x2a1   : > { %1303 = vpow2.f32 %v1204_v40  ;;  %v1205_v44 = vmul.f32 -1.442695, %v923_v41  ;;  %v925_v45 = vadd.f32 %v924_v43, %v820_v57  ;;  %v697_v57 = vadd.f32 1.0, %v1292_v51 }
 0x2a2   : > { %1305 = vpow2.f32 %v1193_v33  ;;  %v928_v47 = vpop.f32.mrf.mxu1 }
 0x2a3   : > { %1307 = vpow2.f32 %v1205_v44  ;;  %v1206_v48 = vmul.f32 -1.442695, %v925_v45  ;;  %v929_v49 = vadd.f32 %v928_v47, %v825_v58  ;;  %v1786_v44 = vstv %s989_s17 }
 0x2a4   : > { %1309 = vpow2.f32 %v1194_v42  ;;  %v930_v50 = vpop.f32.mrf.mxu1 }
 0x2a5   : > { %1311 = vpow2.f32 %v1206_v48  ;;  %v1207_v52 = vmul.f32 -1.442695, %v929_v49  ;;  %v931_v53 = vadd.f32 %v930_v50, %v825_v58  ;;  %v1788_v48 = vstv %s988_s0 }
 0x2a6   : > { %1313 = vpow2.f32 %v1195_v46  ;;  %v934_v54 = vpop.f32.mrf.mxu1 }
 0x2a7   : > { %1315 = vpow2.f32 %v1207_v52  ;;  %v1208_v56 = vmul.f32 -1.442695, %v931_v53  ;;  %v935_v60 = vadd.f32 %v934_v54, %v1779_v59 }
 0x2a8   : > { %v936_v61 = vpop.f32.mrf.mxu1 }
 0x2a9   : > { %1317 = vpow2.f32 %v1208_v56  ;;  %v1209_v63 = vmul.f32 -1.442695, %v935_v60  ;;  %v937_v1 = vadd.f32 %v936_v61, %v1779_v59 }
 0x2ab   : > { %1319 = vpow2.f32 %v1209_v63  ;;  %v1210_v58 = vmul.f32 -1.442695, %v937_v1 }
 0x2ac   : > { %v1300_v12 = vpop.eup %1299  ;;  %1321 = vrcp.f32 %v697_v57 }
 0x2ad   : > { %v1302_v13 = vpop.eup %1301  ;;  %v963_v14 = vadd.f32 1.0, %v1300_v12  ;;  %1323 = vpow2.f32 %v1210_v58 }
 0x2ae   : > { %v1304_v15 = vpop.eup %1303  ;;  %1325 = vrcp.f32 %v698_v8  ;;  %v701_v19 = vadd.f32 1.0, %v1302_v13 }
 0x2af   : > { %v1306_v17 = vpop.eup %1305  ;;  %1327 = vrcp.f32 %v963_v14  ;;  %v964_v18 = vadd.f32 1.0, %v1304_v15 }
 0x2b0   : > { %v1308_v59 = vpop.eup %1307  ;;  %1329 = vrcp.f32 %v699_v0  ;;  %v702_v23 = vadd.f32 1.0, %v1306_v17 }
 0x2b1   : > { %v1310_v20 = vpop.eup %1309  ;;  %1331 = vrcp.f32 %v964_v18  ;;  %v965_v21 = vadd.f32 1.0, %v1308_v59 }
 0x2b2   : > { %v1312_v22 = vpop.eup %1311  ;;  %1333 = vrcp.f32 %v700_v16  ;;  %v703_v27 = vadd.f32 1.0, %v1310_v20 }
 0x2b3   : > { %v1314_v24 = vpop.eup %1313  ;;  %1335 = vrcp.f32 %v965_v21  ;;  %v966_v25 = vadd.f32 1.0, %v1312_v22 }
 0x2b4   : > { %v1316_v26 = vpop.eup %1315  ;;  %1337 = vrcp.f32 %v701_v19  ;;  %v704_v38 = vadd.f32 1.0, %v1314_v24 }
 0x2b5   : > { %1339 = vrcp.f32 %v966_v25  ;;  %v967_v28 = vadd.f32 1.0, %v1316_v26 }
 0x2b6   : > { %v1318_v33 = vpop.eup %1317  ;;  %1341 = vrcp.f32 %v702_v23 }
 0x2b7   : > { %1343 = vrcp.f32 %v967_v28  ;;  %v968_v39 = vadd.f32 1.0, %v1318_v33 }
 0x2b8   : > { %v1320_v40 = vpop.eup %1319  ;;  %1345 = vrcp.f32 %v703_v27 }
 0x2b9   : > { %v1322_v41 = vpop.eup %1321  ;;  %1347 = vrcp.f32 %v968_v39  ;;  %v969_v42 = vadd.f32 1.0, %v1320_v40 }
 0x2ba   : > { %v1324_v43 = vpop.eup %1323  ;;  %1349 = vrcp.f32 %v704_v38  ;;  %v1008_v50 = vadd.f32 1.0, %v1322_v41 }
 0x2bb   : > { %v1326_v45 = vpop.eup %1325  ;;  %1351 = vrcp.f32 %v969_v42  ;;  %v970_v46 = vadd.f32 1.0, %v1324_v43 }
 0x2bc   : > { %v1328_v47 = vpop.eup %1327  ;;  %v1009_v53 = vadd.f32 1.0, %v1326_v45  ;;  %v1016_v62 = vmul.f32 %v1008_v50, %v1661_v10 }
 0x2bd   : > { %v1330_v49 = vpop.eup %1329  ;;  %v991_v51 = vmul.f32 %v1328_v47, %v1786_v44  ;;  %1353 = vrcp.f32 %v970_v46 }
 0x2be   : > { %v1332_v52 = vpop.eup %1331  ;;  %v1010_v57 = vadd.f32 1.0, %v1330_v49  ;;  %v1017_v58 = vmul.f32 %v1009_v53, %v1658_v9 }
 0x2bf   : > { %v1334_v54 = vpop.eup %1333  ;;  %v1000_v55 = vadd.f32 %v1788_v48, %v991_v51  ;;  %v992_v56 = vmul.f32 %v1332_v52, %v1786_v44 }
 0x2c0   : > { %v1336_v60 = vpop.eup %1335  ;;  %v1011_v12 = vadd.f32 1.0, %v1334_v54 }
 0x2c1   : > { %v1338_v61 = vpop.eup %1337  ;;  %v1024_v63 = vmul.f32 %v1000_v55, %v1740_v37  ;;  %v1001_v1 = vadd.f32 %v1788_v48, %v992_v56  ;;  %v993_v8 = vmul.f32 %v1336_v60, %v1786_v44  ;;  %v1018_v37 = vmul.f32 %v1010_v57, %v1652_v7 }
 0x2c2   : > { %v1340_v11 = vpop.eup %1339  ;;  %v1012_v17 = vadd.f32 1.0, %v1338_v61  ;;  %v1019_v22 = vmul.f32 %v1011_v12, %v1649_v6 }
 0x2c3   : > { %v1342_v0 = vpop.eup %1341  ;;  %v1032_v13 = vadd.f32 %v1024_v63, %v1016_v62  ;;  %v1025_v14 = vmul.f32 %v1001_v1, %v1735_v36  ;;  %v1002_v15 = vadd.f32 %v1788_v48, %v993_v8  ;;  %v994_v16 = vmul.f32 %v1340_v11, %v1786_v44 }
 0x2c4   : > { %v1344_v10 = vpop.eup %1343  ;;  %v1013_v21 = vadd.f32 1.0, %v1342_v0 }
 0x2c5   : > { %v1346_v18 = vpop.eup %1345  ;;  %1040 = vst [vmem:[%s1804_s29] sm:$0xff] %v1032_v13  ;;  %v1033_v9 = vadd.f32 %v1025_v14, %v1017_v58  ;;  %v1026_v59 = vmul.f32 %v1002_v15, %v1731_v35  ;;  %v1003_v36 = vadd.f32 %v1788_v48, %v994_v16  ;;  %v995_v19 = vmul.f32 %v1344_v10, %v1786_v44 }
 0x2c6   : > { %v1348_v20 = vpop.eup %1347  ;;  %v1020_v35 = vmul.f32 %v1012_v17, %v1646_v5  ;;  %v1014_v28 = vadd.f32 1.0, %v1346_v18  ;;  %v1021_v40 = vmul.f32 %v1013_v21, %v1643_v4 }
 0x2c7   : > { %v1350_v7 = vpop.eup %1349  ;;  %1041 = vst [vmem:[%s1804_s29 + $0x8] sm:$0xff] %v1033_v9  ;;  %v1034_v23 = vadd.f32 %v1026_v59, %v1018_v37  ;;  %v1027_v24 = vmul.f32 %v1003_v36, %v1726_v34  ;;  %v1004_v25 = vadd.f32 %v1788_v48, %v995_v19  ;;  %v996_v26 = vmul.f32 %v1348_v20, %v1786_v44 }
 0x2c8   : > { %v1352_v27 = vpop.eup %1351  ;;  %v1015_v41 = vadd.f32 1.0, %v1350_v7  ;;  %v1022_v45 = vmul.f32 %v1014_v28, %v1641_v3 }
 0x2c9   : > { %1042 = vst [vmem:[%s1804_s29 + $0x10] sm:$0xff] %v1034_v23  ;;  %v1035_v33 = vadd.f32 %v1027_v24, %v1019_v22  ;;  %v1028_v38 = vmul.f32 %v1004_v25, %v1719_v32  ;;  %v1005_v6 = vadd.f32 %v1788_v48, %v996_v26  ;;  %v997_v39 = vmul.f32 %v1352_v27, %v1786_v44 }
 0x2ca   : > { %v1354_v34 = vpop.eup %1353 }
 0x2cb   : > { %1043 = vst [vmem:[%s1804_s29 + $0x18] sm:$0xff] %v1035_v33  ;;  %v1036_v42 = vadd.f32 %v1028_v38, %v1020_v35  ;;  %v1029_v5 = vmul.f32 %v1005_v6, %v1714_v31  ;;  %v1006_v43 = vadd.f32 %v1788_v48, %v997_v39  ;;  %v998_v32 = vmul.f32 %v1354_v34, %v1786_v44 }
 0x2cc   : > { %v1023_v31 = vmul.f32 %v1015_v41, %v1639_v2 }
 0x2cd   : > { %1044 = vst [vmem:[%s1804_s29 + $0x20] sm:$0xff] %v1036_v42  ;;  %v1037_v46 = vadd.f32 %v1029_v5, %v1021_v40  ;;  %v1030_v47 = vmul.f32 %v1006_v43, %v1709_v30  ;;  %v1007_v4 = vadd.f32 %v1788_v48, %v998_v32 }
 0x2cf   : > { %1045 = vst [vmem:[%s1804_s29 + $0x28] sm:$0xff] %v1037_v46  ;;  %v1038_v49 = vadd.f32 %v1030_v47, %v1022_v45  ;;  %v1031_v50 = vmul.f32 %v1007_v4, %v1704_v29 }
 0x2d1   : > { %1046 = vst [vmem:[%s1804_s29 + $0x30] sm:$0xff] %v1038_v49  ;;  %v1039_v3 = vadd.f32 %v1031_v50, %v1023_v31 }
 0x2d3   : > { %1047 = vst [vmem:[%s1804_s29 + $0x38] sm:$0xff] %v1039_v3 }
 0x2d4   : > { %1396 = shalt.err (!%p1393_p7)
}
 0x2d5   : > { %s1397_s19 = scalar_lea.hbm %s1837_s18, 1024  ;;  %s1401_s29 = scalar_lea.hbm %s1900_s11, 2048 }
 0x2d6   : > { %p1398_p10 = scmp.ne.s32.totalorder %s1837_s18, %s1397_s19  ;;  %p1402_p2 = scmp.lt.s32.totalorder %s1837_s18, %s1900_s11 }
 0x2d7   : > { %p1403_p12 = scmp.lt.s32.totalorder %s1401_s29, %s1397_s19 }
 0x2d8   : > { %p1399_p4 = pnand %p1398_p10, %p1587_p9 }
 0x2d9   : > { %p1404_p8 = por %p1403_p12, %p1402_p2 }
 0x2da   : > { %p1400_p13 = pneg %p1399_p4 }
 0x2dc   : > { %p1405_p0 = pnand %p1404_p8, %p1400_p13 }
 0x2de   : > { %1408 = shalt.err (!%p1405_p0)
}
 0x2df   : > { %s1471_s30 = smov 256   ;;  %s1472_s16 = smov 16  }
 0x2e0   : > { %1223 = dma.vmem_to_hbm [thread:$0]  (%p1587_p9), %s1839_s25, 1024, %s1837_s18, %s1049_s22, %s1471_s30, %s1471_s30, %s1472_s16  }
 0x2e1 PF: > { %s1913_s26 = sld [smem:[#allocation10_spill]]  ;;  %p1914_p1 = scmp.ge.s32.totalorder %s1463_s24, 2 }
 0x2e3   : > { %p1230_p3 = pnand %p1914_p1, %p1594_p11 }
 0x2e5   : > { %p1231_p5 = pneg %p1230_p3 }
 0x2e7   : > { %s1079_s28 = sand.u32 1, %s1913_s26  }
 0x2e8   : > { %s1080_s15 = scalar_lea.sflag [#allocation6], %s1079_s28 }
 0x2e9   : > { %1438 = dma.done.wait (%p1231_p5), %s1080_s15, 1024  }
 0x2ea   : > { %1440 = vsyncadd (%p1231_p5), %s1080_s15, 4294966272  ;;  %s28_s24 = sadd.s32 1, %s1463_s24   ;;  %s1915_s12 = sld [smem:[#allocation13_spill]] }
 0x2eb   : > { %p25_p6 = scmp.ge.s32.totalorder %s28_s24, 4   ;;  %s1916_s22 = sld [smem:[#allocation11_spill]] }
 0x2ec   : > { %s1917_s23 = sld [smem:[#allocation12_spill]]  ;;  %s1918_s19 = smov %s1447_s20 }
 0x2ed   : > { %s1919_s20 = smov %s1451_s21  ;;  %27 = sbr.rel (!%p25_p6) target bundleno = 8 (0x8), region = 108 }
 0x2f0   : > { %s1920_s21 = smov %s1915_s12 }
 0x2f2   :  { %1085 = vsyncpa [#allocation5], 1 }
 0x2f3   :  { %1087 = vsyncpa [#allocation5 + $0x1], 1 }
 0x2f4   :  { %1088 = vsyncpa [#allocation6], 1 }
 0x2f5   :  { %1090 = vsyncpa [#allocation6 + $0x1], 1 }

</bundles_post_ra>
